<compile_context>
chip_gen: v5e
topology: v5e:2x2
jax: 0.10.0
libtpu: 0.0.40
codegen_flags: <defaults>
</compile_context>

<pallas_src>
import jax
import jax.numpy as jnp
from jax.experimental import pallas as pl
from jax.experimental.pallas import tpu as pltpu


def _round_up(x, m):
    return ((x + m - 1) // m) * m


def _conditioning_kernel(s_ref, g_ref, z_ref,
                         w1s_ref, w1g_ref, w1z_ref, b1_ref,
                         w2_ref, b2_ref, out_ref):
    # s_ref  : (TB, state_dim)      VMEM   batch tile of `start`
    # g_ref  : (TB, state_dim)      VMEM   batch tile of `goal`
    # z_ref  : (TB, z_env_dim)      VMEM   batch tile of `z_env`
    # w1*_ref: (k, C_pad)           VMEM   W1 split along its input (K) dim
    # b1_ref : (1, C_pad)           VMEM
    # w2_ref : (C_pad, C_pad)       VMEM
    # b2_ref : (1, C_pad)           VMEM
    # out_ref: (TB, C_pad)          VMEM   lane-dense output tile
    #
    # fc1 as split-K matmul == matmul over the concatenated features,
    # so the concat never materializes.
    c1 = jnp.dot(s_ref[...], w1s_ref[...], preferred_element_type=jnp.float32)
    c1 = c1 + jnp.dot(g_ref[...], w1g_ref[...], preferred_element_type=jnp.float32)
    c1 = c1 + jnp.dot(z_ref[...], w1z_ref[...], preferred_element_type=jnp.float32)
    c1 = jnp.maximum(c1 + b1_ref[...], 0.0)                       # ReLU(fc1)
    # fc2 + bias + residual (residual uses post-ReLU c1, matching PyTorch).
    c2 = jnp.dot(c1, w2_ref[...], preferred_element_type=jnp.float32) + b2_ref[...]
    out_ref[...] = (c2 + c1).astype(out_ref.dtype)


def init_params(key, context_dim, z_env_dim, state_dim):
    """Synthetic init mirroring nn.Linear default (uniform +/- 1/sqrt(fan_in)).

    Weights are stored pre-transposed: (in_features, out_features)."""
    d_in = z_env_dim + 2 * state_dim
    k1, k2, k3, k4 = jax.random.split(key, 4)
    bound1 = 1.0 / jnp.sqrt(d_in)
    bound2 = 1.0 / jnp.sqrt(context_dim)
    w1 = jax.random.uniform(k1, (d_in, context_dim), jnp.float32, -bound1, bound1)
    b1 = jax.random.uniform(k2, (1, context_dim), jnp.float32, -bound1, bound1)
    w2 = jax.random.uniform(k3, (context_dim, context_dim), jnp.float32, -bound2, bound2)
    b2 = jax.random.uniform(k4, (1, context_dim), jnp.float32, -bound2, bound2)
    return {"w1": w1, "b1": b1, "w2": w2, "b2": b2}


def pack_params(params, state_dim, lane=128):
    """Split W1 into (start, goal, z_env) pieces and zero-pad context_dim to a
    lane-dense multiple of `lane`. Zero padding is exact: padded output
    columns stay identically zero and are sliced off in the wrapper."""
    w1, b1, w2, b2 = params["w1"], params["b1"], params["w2"], params["b2"]
    _, C = w1.shape
    C_pad = _round_up(C, lane)
    pc = C_pad - C
    w1p = jnp.pad(w1, ((0, 0), (0, pc)))
    packed = {
        "w1s": w1p[:state_dim],
        "w1g": w1p[state_dim:2 * state_dim],
        "w1z": w1p[2 * state_dim:],
        "b1": jnp.pad(b1, ((0, 0), (0, pc))),
        "w2": jnp.pad(w2, ((0, pc), (0, pc))),
        "b2": jnp.pad(b2, ((0, 0), (0, pc))),
        "context_dim": C,
    }
    return packed


def _pad_rows(x, n_rows):
    pad = n_rows - x.shape[0]
    if pad:
        x = jnp.pad(x, ((0, pad), (0, 0)))
    return x


def conditioning_network_forward(start, goal, z_env, packed):
    """Pallas implementation of ConditioningNetwork.forward."""
    w1s, w1g, w1z = packed["w1s"], packed["w1g"], packed["w1z"]
    b1, w2, b2 = packed["b1"], packed["w2"], packed["b2"]
    C = packed["context_dim"]
    C_pad = w2.shape[0]

    start = start.astype(jnp.float32)
    goal = goal.astype(jnp.float32)
    z_env = z_env.astype(jnp.float32)

    B = start.shape[0]
    sd = start.shape[1]
    zd = z_env.shape[1]
    d_in = 2 * sd + zd

    # Batch tiling: multiple of 8 sublanes, capped so VMEM stays small and
    # Pallas can double-buffer activation tiles across a "parallel" grid.
    TB = min(512, _round_up(B, 8))
    B_pad = _round_up(B, TB)
    start_p = _pad_rows(start, B_pad)
    goal_p = _pad_rows(goal, B_pad)
    z_p = _pad_rows(z_env, B_pad)

    grid = (B_pad // TB,)

    cost = pl.CostEstimate(
        flops=2 * B_pad * (d_in * C_pad + C_pad * C_pad),
        transcendentals=0,
        bytes_accessed=4 * (B_pad * (d_in + C_pad)
                            + d_in * C_pad + C_pad * C_pad + 2 * C_pad),
    )

    out = pl.pallas_call(
        _conditioning_kernel,
        out_shape=jax.ShapeDtypeStruct((B_pad, C_pad), jnp.float32),
        grid=grid,
        in_specs=[
            # Batch-tiled activations (last dim == full array dim, so the
            # narrow feature widths are legal block shapes).
            pl.BlockSpec((TB, sd), lambda i: (i, 0)),
            pl.BlockSpec((TB, sd), lambda i: (i, 0)),
            pl.BlockSpec((TB, zd), lambda i: (i, 0)),
            # Weights / biases: constant index_map -> DMA'd once, resident
            # across all batch tiles.
            pl.BlockSpec((sd, C_pad), lambda i: (0, 0)),
            pl.BlockSpec((sd, C_pad), lambda i: (0, 0)),
            pl.BlockSpec((zd, C_pad), lambda i: (0, 0)),
            pl.BlockSpec((1, C_pad), lambda i: (0, 0)),
            pl.BlockSpec((C_pad, C_pad), lambda i: (0, 0)),
            pl.BlockSpec((1, C_pad), lambda i: (0, 0)),
        ],
        out_specs=pl.BlockSpec((TB, C_pad), lambda i: (i, 0)),
        compiler_params=pltpu.CompilerParams(
            dimension_semantics=("parallel",),
            vmem_limit_bytes=64 * 1024 * 1024,
        ),
        cost_estimate=cost,
    )(start_p, goal_p, z_p, w1s, w1g, w1z, b1, w2, b2)

    # Drop batch padding and lane padding.
    return out[:B, :C]


def reference_forward(start, goal, z_env, params):
    """Pure-JAX reference for correctness checking (unpadded params)."""
    h = jnp.concatenate((start, goal, z_env), axis=1)
    c1 = jnp.maximum(h @ params["w1"] + params["b1"], 0.0)
    return (c1 @ params["w2"] + params["b2"]) + c1


if __name__ == "__main__":
    # Small shapes consistent with the module's forward signature.
    batch = 2
    state_dim = 4
    z_env_dim = 16
    context_dim = 32

    key = jax.random.PRNGKey(0)
    kp, ks, kg, kz = jax.random.split(key, 4)

    params = init_params(kp, context_dim, z_env_dim, state_dim)
    packed = pack_params(params, state_dim)

    start = jax.random.normal(ks, (batch, state_dim), jnp.float32)
    goal = jax.random.normal(kg, (batch, state_dim), jnp.float32)
    z_env = jax.random.normal(kz, (batch, z_env_dim), jnp.float32)

    out = conditioning_network_forward(start, goal, z_env, packed)
    out = jax.block_until_ready(out)

    ref = reference_forward(start, goal, z_env, params)
    assert out.shape == (batch, context_dim)
    assert jnp.allclose(out, ref, atol=1e-5, rtol=1e-5), "mismatch vs reference"

    print("KERNEL_OK")
</pallas_src>

<mosaic_0001>
module attributes {stable_mosaic.version = 11 : i64} {
  func.func @_conditioning_kernel(%arg0: i32, %arg1: memref<8x4xf32, #tpu.memory_space<vmem>>, %arg2: memref<8x4xf32, #tpu.memory_space<vmem>>, %arg3: memref<8x16xf32, #tpu.memory_space<vmem>>, %arg4: memref<4x128xf32, #tpu.memory_space<vmem>>, %arg5: memref<4x128xf32, #tpu.memory_space<vmem>>, %arg6: memref<16x128xf32, #tpu.memory_space<vmem>>, %arg7: memref<1x128xf32, #tpu.memory_space<vmem>>, %arg8: memref<128x128xf32, #tpu.memory_space<vmem>>, %arg9: memref<1x128xf32, #tpu.memory_space<vmem>>, %arg10: memref<8x128xf32, #tpu.memory_space<vmem>>) attributes {dimension_semantics = [#tpu.dimension_semantics<parallel>], iteration_bounds = array<i64: 1>, scalar_prefetch = 0 : i64, scratch_operands = 0 : i64, tpu.core_type = #tpu.core_type<tc>, window_params = [{transform_indices = @transform_0, window_bounds = array<i64: 8, 4>}, {transform_indices = @transform_1, window_bounds = array<i64: 8, 4>}, {transform_indices = @transform_2, window_bounds = array<i64: 8, 16>}, {pipeline_mode = #tpu.pipeline_mode<synchronous>, transform_indices = @transform_3, window_bounds = array<i64: 4, 128>}, {pipeline_mode = #tpu.pipeline_mode<synchronous>, transform_indices = @transform_4, window_bounds = array<i64: 4, 128>}, {pipeline_mode = #tpu.pipeline_mode<synchronous>, transform_indices = @transform_5, window_bounds = array<i64: 16, 128>}, {pipeline_mode = #tpu.pipeline_mode<synchronous>, transform_indices = @transform_6, window_bounds = array<i64: 1, 128>}, {pipeline_mode = #tpu.pipeline_mode<synchronous>, transform_indices = @transform_7, window_bounds = array<i64: 128, 128>}, {pipeline_mode = #tpu.pipeline_mode<synchronous>, transform_indices = @transform_8, window_bounds = array<i64: 1, 128>}, {transform_indices = @transform_9, window_bounds = array<i64: 8, 128>}]} {
    %c0 = arith.constant 0 : index
    %c0_0 = arith.constant 0 : index
    %0 = vector.load %arg1[%c0, %c0_0] : memref<8x4xf32, #tpu.memory_space<vmem>>, vector<8x4xf32>
    %c0_1 = arith.constant 0 : index
    %c0_2 = arith.constant 0 : index
    %1 = vector.load %arg4[%c0_1, %c0_2] : memref<4x128xf32, #tpu.memory_space<vmem>>, vector<4x128xf32>
    %cst = arith.constant dense<0.000000e+00> : vector<8x128xf32>
    %2 = tpu.matmul %0, %1, %cst {dimension_numbers = #tpu.dot_dimension_numbers<[1], [0], [0], [1], [0, 0, 1, 1], [], []>} : vector<8x4xf32>, vector<4x128xf32>, vector<8x128xf32> -> vector<8x128xf32>
    %c0_3 = arith.constant 0 : index
    %c0_4 = arith.constant 0 : index
    %3 = vector.load %arg2[%c0_3, %c0_4] : memref<8x4xf32, #tpu.memory_space<vmem>>, vector<8x4xf32>
    %c0_5 = arith.constant 0 : index
    %c0_6 = arith.constant 0 : index
    %4 = vector.load %arg5[%c0_5, %c0_6] : memref<4x128xf32, #tpu.memory_space<vmem>>, vector<4x128xf32>
    %cst_7 = arith.constant dense<0.000000e+00> : vector<8x128xf32>
    %5 = tpu.matmul %3, %4, %cst_7 {dimension_numbers = #tpu.dot_dimension_numbers<[1], [0], [0], [1], [0, 0, 1, 1], [], []>} : vector<8x4xf32>, vector<4x128xf32>, vector<8x128xf32> -> vector<8x128xf32>
    %6 = arith.addf %2, %5 : vector<8x128xf32>
    %c0_8 = arith.constant 0 : index
    %c0_9 = arith.constant 0 : index
    %7 = vector.load %arg3[%c0_8, %c0_9] : memref<8x16xf32, #tpu.memory_space<vmem>>, vector<8x16xf32>
    %c0_10 = arith.constant 0 : index
    %c0_11 = arith.constant 0 : index
    %8 = vector.load %arg6[%c0_10, %c0_11] : memref<16x128xf32, #tpu.memory_space<vmem>>, vector<16x128xf32>
    %cst_12 = arith.constant dense<0.000000e+00> : vector<8x128xf32>
    %9 = tpu.matmul %7, %8, %cst_12 {dimension_numbers = #tpu.dot_dimension_numbers<[1], [0], [0], [1], [0, 0, 1, 1], [], []>} : vector<8x16xf32>, vector<16x128xf32>, vector<8x128xf32> -> vector<8x128xf32>
    %10 = arith.addf %6, %9 : vector<8x128xf32>
    %c0_13 = arith.constant 0 : index
    %c0_14 = arith.constant 0 : index
    %11 = vector.load %arg7[%c0_13, %c0_14] : memref<1x128xf32, #tpu.memory_space<vmem>>, vector<1x128xf32>
    %12 = vector.broadcast %11 : vector<1x128xf32> to vector<8x128xf32>
    %13 = arith.addf %10, %12 : vector<8x128xf32>
    %cst_15 = arith.constant 0.000000e+00 : f32
    %14 = vector.broadcast %cst_15 : f32 to vector<8x128xf32>
    %15 = arith.maximumf %13, %14 : vector<8x128xf32>
    %c0_16 = arith.constant 0 : index
    %c0_17 = arith.constant 0 : index
    %16 = vector.load %arg8[%c0_16, %c0_17] : memref<128x128xf32, #tpu.memory_space<vmem>>, vector<128x128xf32>
    %cst_18 = arith.constant dense<0.000000e+00> : vector<8x128xf32>
    %17 = tpu.matmul %15, %16, %cst_18 {dimension_numbers = #tpu.dot_dimension_numbers<[1], [0], [0], [1], [0, 0, 1, 1], [], []>} : vector<8x128xf32>, vector<128x128xf32>, vector<8x128xf32> -> vector<8x128xf32>
    %c0_19 = arith.constant 0 : index
    %c0_20 = arith.constant 0 : index
    %18 = vector.load %arg9[%c0_19, %c0_20] : memref<1x128xf32, #tpu.memory_space<vmem>>, vector<1x128xf32>
    %19 = vector.broadcast %18 : vector<1x128xf32> to vector<8x128xf32>
    %20 = arith.addf %17, %19 : vector<8x128xf32>
    %21 = arith.addf %20, %15 : vector<8x128xf32>
    %c0_21 = arith.constant 0 : index
    %c0_22 = arith.constant 0 : index
    %22 = vector.load %arg10[%c0_21, %c0_22] : memref<8x128xf32, #tpu.memory_space<vmem>>, vector<8x128xf32>
    tpu.vector_store %arg10[%c0_21, %c0_22], %21 {strides = array<i32>} : memref<8x128xf32, #tpu.memory_space<vmem>>, vector<8x128xf32>,
    return
  }
  func.func @transform_0(%arg0: i32) -> (i32, i32) {
    %c0_i32 = arith.constant 0 : i32
    %c0_i32_0 = arith.constant 0 : i32
    return %arg0, %c0_i32 : i32, i32
  }
  func.func @transform_1(%arg0: i32) -> (i32, i32) {
    %c0_i32 = arith.constant 0 : i32
    %c0_i32_0 = arith.constant 0 : i32
    return %arg0, %c0_i32 : i32, i32
  }
  func.func @transform_2(%arg0: i32) -> (i32, i32) {
    %c0_i32 = arith.constant 0 : i32
    %c0_i32_0 = arith.constant 0 : i32
    return %arg0, %c0_i32 : i32, i32
  }
  func.func @transform_3(%arg0: i32) -> (i32, i32) {
    %c0_i32 = arith.constant 0 : i32
    %c0_i32_0 = arith.constant 0 : i32
    %c0_i32_1 = arith.constant 0 : i32
    return %c0_i32, %c0_i32_0 : i32, i32
  }
  func.func @transform_4(%arg0: i32) -> (i32, i32) {
    %c0_i32 = arith.constant 0 : i32
    %c0_i32_0 = arith.constant 0 : i32
    %c0_i32_1 = arith.constant 0 : i32
    return %c0_i32, %c0_i32_0 : i32, i32
  }
  func.func @transform_5(%arg0: i32) -> (i32, i32) {
    %c0_i32 = arith.constant 0 : i32
    %c0_i32_0 = arith.constant 0 : i32
    %c0_i32_1 = arith.constant 0 : i32
    return %c0_i32, %c0_i32_0 : i32, i32
  }
  func.func @transform_6(%arg0: i32) -> (i32, i32) {
    %c0_i32 = arith.constant 0 : i32
    %c0_i32_0 = arith.constant 0 : i32
    %c0_i32_1 = arith.constant 0 : i32
    return %c0_i32, %c0_i32_0 : i32, i32
  }
  func.func @transform_7(%arg0: i32) -> (i32, i32) {
    %c0_i32 = arith.constant 0 : i32
    %c0_i32_0 = arith.constant 0 : i32
    %c0_i32_1 = arith.constant 0 : i32
    return %c0_i32, %c0_i32_0 : i32, i32
  }
  func.func @transform_8(%arg0: i32) -> (i32, i32) {
    %c0_i32 = arith.constant 0 : i32
    %c0_i32_0 = arith.constant 0 : i32
    %c0_i32_1 = arith.constant 0 : i32
    return %c0_i32, %c0_i32_0 : i32, i32
  }
  func.func @transform_9(%arg0: i32) -> (i32, i32) {
    %c0_i32 = arith.constant 0 : i32
    %c0_i32_0 = arith.constant 0 : i32
    return %arg0, %c0_i32 : i32, i32
  }
}

</mosaic_0001>

<bundles_post_ra>
// kernel: tpu_custom_call.1
= control target key start
LH: loop header
LB: loop body
LE: loop exit
PB: predicated region body
PF: predicated region fallthrough
CT: control target
= control target key end

     0   :  { %14 = vsyncpa [#allocation3], 0  ;;  %s393_s0 = inlined_call_operand.vmem [shape: f32[8,4], index: 0, kind: input, shape index: {}]   ;;  %s394_s1 = inlined_call_operand.vmem [shape: f32[8,4], index: 1, kind: input, shape index: {}]   ;;  %s395_s2 = inlined_call_operand.vmem [shape: f32[8,16], index: 2, kind: input, shape index: {}]   ;;  %s396_s3 = inlined_call_operand.vmem [shape: f32[4,128], index: 3, kind: input, shape index: {}]   ;;  %s397_s4 = inlined_call_operand.hbm [shape: f32[4,128], index: 4, kind: input, shape index: {}]   ;;  %s398_s5 = inlined_call_operand.vmem [shape: f32[16,128], index: 5, kind: input, shape index: {}]   ;;  %s399_s6 = inlined_call_operand.vmem [shape: f32[1,128], index: 6, kind: input, shape index: {}]   ;;  %s400_s7 = inlined_call_operand.hbm [shape: f32[128,128], index: 7, kind: input, shape index: {}]   ;;  %s401_s8 = inlined_call_operand.vmem [shape: f32[1,128], index: 8, kind: input, shape index: {}]   ;;  %s402_s9 = inlined_call_operand.hbm [shape: f32[8,128], index: 9, kind: output, shape index: {}]  }
   0x1   :  { %15 = vsyncpa [#allocation6], 0 }
   0x2   :  { %16 = vsyncpa [#allocation4], 0  ;;  %s30_s11 = sshll.u32 %s397_s4, 4  ;;  %s305_s12 = smov [#allocation2]   ;;  %s31_s11 = int_to_ptr.hbm [resolvable:$true] %s30_s11 }
   0x3   :  { %s32_s13 = sshll.u32 %s305_s12, 4  ;;  %s44_s16 = sshll.u32 %s400_s7, 4  ;;  %s33_s13 = int_to_ptr.vmem [resolvable:$true] %s32_s13  ;;  %s45_s16 = int_to_ptr.hbm [resolvable:$true] %s44_s16 }
   0x4   :  { %35 = dma.hbm_to_vmem [thread:$0]  %s31_s11, 64, %s33_s13, [#allocation3]  }
   0x5   :  { %s306_s17 = smov [#allocation5]   ;;  %s307_s19 = smov 128  }
   0x6   :  { %s46_s18 = sshll.u32 %s306_s17, 4  ;;  %s308_s20 = smov 8   ;;  %s47_s18 = int_to_ptr.vmem [resolvable:$true] %s46_s18 }
   0x7   :  { %52 = dma.hbm_to_vmem [thread:$0]  %s45_s16, 2048, %s47_s18, [#allocation6], %s307_s19, %s307_s19, %s308_s20  }
   0x8   :  { %299 = dma.done.wait [#allocation3], 64  }
   0x9   :  { %300 = vsyncadd [#allocation3], 4294967232 }
   0xa   :  { %301 = dma.done.wait [#allocation6], 2048  }
   0xb   :  { %302 = vsyncadd [#allocation6], 4294965248  ;;  %vm71_vm0 = vcmask 1043456   ;;  %v123_v0 = vld [vmem:[%s398_s5 + $0x8] sm:$0xff]  ;;  %v122_v1 = vld [vmem:[%s398_s5] sm:$0xff]  ;;  %vm67_vm1 = vcmask 31744  }
   0xc   :  { %v121_v2 = vld [vmem:[%s395_s2] sm:$0xff]  ;;  %142 = vmatpush.msra.mxu2 %v123_v0  ;;  %vm124_vm2 = vcmask 130048   ;;  %v66_v3 = vld [vmem:[#allocation2] sm:$0xf]  ;;  %v167_v10 = vld [vmem:[#allocation5 + $0x60] sm:$0xff]  ;;  %s309_s30 = smov [#allocation7]  }
   0xd   :  { %v64_v4 = vld [vmem:[%s396_s3] sm:$0xf]  ;;  %215 = vmatpush.msk.msra.mxu0 %vm71_vm0, %v66_v3  ;;  %v170_v7 = vld [vmem:[#allocation5 + $0x78] sm:$0xff]  ;;  %v169_v8 = vld [vmem:[#allocation5 + $0x70] sm:$0xff]  ;;  %s202_s10 = sshll.u32 %s309_s30, 4  ;;  %s204_s13 = sshll.u32 %s402_s9, 4  ;;  %s203_s10 = int_to_ptr.vmem [resolvable:$true] %s202_s10  ;;  %s205_s13 = int_to_ptr.hbm [resolvable:$true] %s204_s13 }
   0xe   :  { %v65_v5 = vld [vmem:[%s394_s1] sm:$0xff]  ;;  %217 = vmatpush.msk.msra.mxu1 %vm71_vm0, %v64_v4  ;;  %143 = vmatpush.msra.mxu2 %v122_v1  ;;  %v166_v11 = vld [vmem:[#allocation5 + $0x58] sm:$0xff]  ;;  %v163_v14 = vld [vmem:[#allocation5 + $0x40] sm:$0xff] }
   0xf   :  { %v63_v6 = vld [vmem:[%s393_s0] sm:$0xff]  ;;  %216 = vmatmul.msk.f32.vlgmr.msra.gmra.mxu0 %vm67_vm1, %v65_v5  ;;  %219 = vmatmul.msk.f32.vlgmr.msra.gmra.mxu2 %vm124_vm2, %v121_v2  ;;  %v162_v15 = vld [vmem:[#allocation5 + $0x38] sm:$0xff]  ;;  %v159_v18 = vld [vmem:[#allocation5 + $0x20] sm:$0xff] }
  0x10   :  { %218 = vmatmul.msk.f32.vlgmr.msra.gmra.mxu1 %vm67_vm1, %v63_v6  ;;  %175 = vmatpush.msra.mxu3 %v170_v7  ;;  %v168_v9 = vld [vmem:[#allocation5 + $0x68] sm:$0xff]  ;;  %v165_v12 = vld [vmem:[#allocation5 + $0x50] sm:$0xff]  ;;  %v158_v19 = vld [vmem:[#allocation5 + $0x18] sm:$0xff] }
  0x11   :  { %v164_v13 = vld [vmem:[#allocation5 + $0x48] sm:$0xff]  ;;  %v161_v16 = vld [vmem:[#allocation5 + $0x30] sm:$0xff]  ;;  %v155_v22 = vld [vmem:[#allocation5] sm:$0xff] }
  0x12   :  { %176 = vmatpush.msra.mxu3 %v169_v8  ;;  %v160_v17 = vld [vmem:[#allocation5 + $0x28] sm:$0xff]  ;;  %v157_v20 = vld [vmem:[#allocation5 + $0x10] sm:$0xff] }
  0x13   :  { %v156_v21 = vld [vmem:[#allocation5 + $0x8] sm:$0xff] }
  0x14   :  { %177 = vmatpush.msra.mxu3 %v168_v9  ;;  %v225_v26 = vld [vmem:[%s399_s6] ss:$0 sm:$0xff] }
  0x15   :  { %v226_v31 = vld [vmem:[%s401_s8] ss:$0 sm:$0xff] }
  0x16   :  { %178 = vmatpush.msra.mxu3 %v167_v10 }
  0x18   :  { %179 = vmatpush.msra.mxu3 %v166_v11 }
  0x1a   :  { %180 = vmatpush.msra.mxu3 %v165_v12 }
  0x1c   :  { %181 = vmatpush.msra.mxu3 %v164_v13 }
  0x1e   :  { %182 = vmatpush.msra.mxu3 %v163_v14 }
  0x20   :  { %183 = vmatpush.msra.mxu3 %v162_v15 }
  0x22   :  { %184 = vmatpush.msra.mxu3 %v161_v16 }
  0x24   :  { %185 = vmatpush.msra.mxu3 %v160_v17 }
  0x26   :  { %186 = vmatpush.msra.mxu3 %v159_v18 }
  0x28   :  { %187 = vmatpush.msra.mxu3 %v158_v19 }
  0x2a   :  { %188 = vmatpush.msra.mxu3 %v157_v20 }
  0x2c   :  { %189 = vmatpush.msra.mxu3 %v156_v21 }
  0x2e   :  { %190 = vmatpush.msra.mxu3 %v155_v22 }
  0x8c   :  { %v92_v23 = vpop.f32.mrf.mxu0 }
  0x8d   :  { %v118_v24 = vpop.f32.mrf.mxu1 }
  0x8e   :  { %v119_v25 = vadd.f32 %v118_v24, %v92_v23 }
  0x92   :  { %v145_v27 = vpop.f32.mrf.mxu2 }
  0x93   :  { %v148_v28 = vadd.f32 %v145_v27, %v119_v25 }
  0x95   :  { %v153_v29 = vadd.f32 %v225_v26, %v148_v28 }
  0x97   :  { %v154_v30 = vmax.f32 %v153_v29, 0.0 }
  0x99   :  { %191 = vmatmul.f32.vlgmr.msra.gmra.mxu3 %v154_v30 }
 0x11c   :  { %v192_v32 = vpop.f32.mrf.mxu3 }
 0x11d   :  { %v193_v33 = vadd.f32 %v226_v31, %v192_v32 }
 0x11f   :  { %v195_v34 = vadd.f32 %v193_v33, %v154_v30 }
 0x121   :  { %196 = vst [vmem:[#allocation7] sm:$0xff] %v195_v34 }
 0x122   :  { %207 = dma.vmem_to_hbm [thread:$0]  %s203_s10, 128, %s205_s13, [#allocation4]  }
 0x123   :  { %303 = dma.done.wait [#allocation4], 128  }
 0x124   :  { %304 = vsyncadd [#allocation4], 4294967168 }
 0x125   :  { %212 = vsyncpa [#allocation3], 1 }
 0x126   :  { %213 = vsyncpa [#allocation6], 1 }
 0x127   :  { %214 = vsyncpa [#allocation4], 1 }

</bundles_post_ra>
